<compile_context>
chip_gen: v6e
topology: v6e:2x2x1
jax: 0.10.0
libtpu: 0.0.40
codegen_flags: <defaults>
</compile_context>

<pallas_src>
import math
import functools

import jax
import jax.numpy as jnp
from jax import lax
from jax.experimental import pallas as pl
from jax.experimental.pallas import tpu as pltpu


# ----------------------------------------------------------------------------
# Tiled matmul + bias kernel (fused QKV/forget-gate projection and out_proj).
#   x:(M,K) bf16, w:(K,N) bf16, b:(1,N) f32 -> o:(M,N) f32
# ----------------------------------------------------------------------------
def _matmul_bias_kernel(x_ref, w_ref, b_ref, o_ref, acc_ref):
    @pl.when(pl.program_id(2) == 0)
    def _init():
        acc_ref[...] = jnp.zeros_like(acc_ref)

    acc_ref[...] += jnp.dot(x_ref[...], w_ref[...],
                            preferred_element_type=jnp.float32)

    @pl.when(pl.program_id(2) == pl.num_programs(2) - 1)
    def _store():
        o_ref[...] = (acc_ref[...] + b_ref[...]).astype(o_ref.dtype)


def _pick_tile(dim, target):
    """Largest tile <= target that evenly divides dim (falls back to full dim)."""
    if dim <= target:
        return dim
    t = target
    while t >= 128:
        if dim % t == 0:
            return t
        t //= 2
    return dim


def linear_bias(x, w_t, b_row, *, out_dtype=jnp.float32, tm=256, tn=256, tk=512):
    """y = x @ w_t + b_row.  w_t is (in_features, out_features), pre-cast to bf16."""
    m, kdim = x.shape
    n = w_t.shape[1]
    tm, tn, tk = _pick_tile(m, tm), _pick_tile(n, tn), _pick_tile(kdim, tk)
    grid = (m // tm, n // tn, kdim // tk)
    return pl.pallas_call(
        _matmul_bias_kernel,
        out_shape=jax.ShapeDtypeStruct((m, n), out_dtype),
        grid=grid,
        in_specs=[
            pl.BlockSpec((tm, tk), lambda i, j, kk: (i, kk)),
            pl.BlockSpec((tk, tn), lambda i, j, kk: (kk, j)),
            pl.BlockSpec((1, tn), lambda i, j, kk: (0, j)),
        ],
        out_specs=pl.BlockSpec((tm, tn), lambda i, j, kk: (i, j)),
        scratch_shapes=[pltpu.VMEM((tm, tn), jnp.float32)],
        compiler_params=pltpu.CompilerParams(
            dimension_semantics=("parallel", "parallel", "arbitrary")),
    )(x, w_t, b_row)


# ----------------------------------------------------------------------------
# Flash-style forgetting attention kernel.
# ----------------------------------------------------------------------------
def _fox_attn_kernel(q_ref, k_ref, v_ref, c_ref, o_ref, m_sc, l_sc, acc_sc, *,
                     sm_scale):
    qi = pl.program_id(2)
    ki = pl.program_id(3)

    @pl.when(ki == 0)
    def _init():
        m_sc[...] = jnp.full_like(m_sc, -jnp.inf)
        l_sc[...] = jnp.zeros_like(l_sc)
        acc_sc[...] = jnp.zeros_like(acc_sc)

    # Causal block pruning: kv tiles strictly above the diagonal contribute
    # nothing -> skip their matmuls and exps entirely.
    @pl.when(ki <= qi)
    def _compute():
        q = q_ref[...]                                   # (tq, D) bf16
        k = k_ref[...]                                   # (tk, D) bf16
        s = lax.dot_general(q, k, (((1,), (1,)), ((), ())),
                            preferred_element_type=jnp.float32) * sm_scale
        # Forgetting decay bias is (c_i - c_j); the per-row constant c_i is
        # dropped (softmax is row-shift invariant) -> only subtract c_j.
        s = s - c_ref[...]                               # (1, tk) f32 broadcast

        # In-block causal mask (only binding on the diagonal tile).
        row = lax.broadcasted_iota(jnp.int32, s.shape, 0)
        col = lax.broadcasted_iota(jnp.int32, s.shape, 1)
        s = jnp.where((row >= col) | (ki < qi), s, jnp.float32(-1e30))

        # Online softmax with f32 accumulators; bf16 feeds to the PV matmul.
        m_prev = m_sc[...]
        m_new = jnp.maximum(m_prev, jnp.max(s, axis=-1, keepdims=True))
        alpha = jnp.exp(m_prev - m_new)
        p = jnp.exp(s - m_new)
        l_sc[...] = alpha * l_sc[...] + jnp.sum(p, axis=-1, keepdims=True)
        acc_sc[...] = alpha * acc_sc[...] + jnp.dot(
            p.astype(jnp.bfloat16), v_ref[...],
            preferred_element_type=jnp.float32)
        m_sc[...] = m_new

    @pl.when(ki == pl.num_programs(3) - 1)
    def _finalize():
        inv_l = pl.reciprocal(l_sc[...], approx=True)
        o_ref[...] = (acc_sc[...] * inv_l).astype(o_ref.dtype)


def _attn_block(s, target=256):
    """Pick a q/kv tile: full S for small S, else a multiple of 128 that divides S."""
    if s <= target:
        return s
    t = (target // 128) * 128
    while t >= 128:
        if s % t == 0:
            return t
        t -= 128
    return s


def forgetting_attention(q, k, v, log_fgate, *, block=None):
    """q, k, v: (B, H, S, D) bf16; log_fgate: (B, H, S) f32 -> (B, H, S, D) bf16."""
    b, h, s, d = q.shape
    if block is None:
        block = _attn_block(s)
    assert s % block == 0, (s, block)
    nblk = s // block

    # Cumulative log forget gate; only the key-side term is needed in-kernel.
    c = jnp.cumsum(log_fgate.astype(jnp.float32), axis=-1)[:, :, None, :]  # (B,H,1,S)
    sm_scale = 1.0 / math.sqrt(d)
    kernel = functools.partial(_fox_attn_kernel, sm_scale=sm_scale)

    q_idx = lambda bi, hi, qi, ki: (bi, hi, qi, 0)
    # Clamp pruned (fully masked) kv steps onto the causal horizon so they
    # reuse the resident block instead of issuing a useless DMA.
    kv_idx = lambda bi, hi, qi, ki: (bi, hi, jnp.minimum(ki, qi), 0)
    c_idx = lambda bi, hi, qi, ki: (bi, hi, 0, jnp.minimum(ki, qi))

    return pl.pallas_call(
        kernel,
        out_shape=jax.ShapeDtypeStruct((b, h, s, d), jnp.bfloat16),
        grid=(b, h, nblk, nblk),
        in_specs=[
            pl.BlockSpec((None, None, block, d), q_idx),
            pl.BlockSpec((None, None, block, d), kv_idx),
            pl.BlockSpec((None, None, block, d), kv_idx),
            pl.BlockSpec((None, None, 1, block), c_idx),
        ],
        out_specs=pl.BlockSpec((None, None, block, d), q_idx),
        scratch_shapes=[
            pltpu.VMEM((block, 1), jnp.float32),   # running max m
            pltpu.VMEM((block, 1), jnp.float32),   # running denom l
            pltpu.VMEM((block, d), jnp.float32),   # output accumulator
        ],
        compiler_params=pltpu.CompilerParams(
            dimension_semantics=("parallel", "parallel", "parallel", "arbitrary")),
    )(q, k, v, c)


# ----------------------------------------------------------------------------
# Module wrapper (parameter setup + reshapes are plain-JAX glue)
# ----------------------------------------------------------------------------
class FoXAttentionPallas:
    def __init__(self, hidden_size, num_attention_heads, key, *, attn_block=None):
        assert hidden_size % num_attention_heads == 0
        self.hidden_size = hidden_size
        self.num_heads = num_attention_heads
        self.head_dim = hidden_size // num_attention_heads
        self.attn_block = attn_block

        ks = jax.random.split(key, 10)
        scale = 0.1
        E, H = hidden_size, num_attention_heads
        # Raw f32 params in PyTorch nn.Linear layout (kept for the reference check).
        self.wq = scale * jax.random.normal(ks[0], (E, E), jnp.float32)
        self.bq = scale * jax.random.normal(ks[1], (E,), jnp.float32)
        self.wk = scale * jax.random.normal(ks[2], (E, E), jnp.float32)
        self.bk = scale * jax.random.normal(ks[3], (E,), jnp.float32)
        self.wv = scale * jax.random.normal(ks[4], (E, E), jnp.float32)
        self.bv = scale * jax.random.normal(ks[5], (E,), jnp.float32)
        self.wf = scale * jax.random.normal(ks[6], (H, E), jnp.float32)
        self.bf = scale * jax.random.normal(ks[7], (H,), jnp.float32)
        self.wo = scale * jax.random.normal(ks[8], (E, E), jnp.float32)
        self.bo = scale * jax.random.normal(ks[9], (E,), jnp.float32)

        # Pre-packed kernel operands: fused (q|k|v|fgate) projection, weights
        # transposed to (in, out) and cast to bf16 once at init (no per-call
        # w.T.astype), biases as f32 (1, N) rows.
        w_qkvf = jnp.concatenate([self.wq, self.wk, self.wv, self.wf], axis=0)
        self.w_qkvf_t = w_qkvf.T.astype(jnp.bfloat16)                    # (E, 3E+H)
        self.b_qkvf = jnp.concatenate(
            [self.bq, self.bk, self.bv, self.bf]).reshape(1, -1).astype(jnp.float32)
        self.wo_t = self.wo.T.astype(jnp.bfloat16)                       # (E, E)
        self.bo_row = self.bo.reshape(1, -1).astype(jnp.float32)

    def __call__(self, hidden_states, attention_mask=None, layer_past=None):
        # attention_mask / layer_past are ignored, matching the reference forward.
        S, B, E = hidden_states.shape
        H, D = self.num_heads, self.head_dim
        x2 = hidden_states.reshape(S * B, E).astype(jnp.bfloat16)

        # Fused q/k/v/forget-gate projection: x is read from HBM once.
        qkvf = linear_bias(x2, self.w_qkvf_t, self.b_qkvf)               # (S*B, 3E+H) f32
        q = qkvf[:, 0 * E:1 * E]
        k = qkvf[:, 1 * E:2 * E]
        v = qkvf[:, 2 * E:3 * E]
        fg = qkvf[:, 3 * E:3 * E + H]

        # TODO(synk): fold these layout transposes into the projection kernel's
        # out_specs (lane-dense (B, S, E) attention I/O) once head_dim >= 128.
        def to_bhsd(x):
            return x.reshape(S, B, H, D).transpose(1, 2, 0, 3).astype(jnp.bfloat16)

        qh, kh, vh = to_bhsd(q), to_bhsd(k), to_bhsd(v)
        log_fgate = jax.nn.log_sigmoid(
            fg.reshape(S, B, H).transpose(1, 2, 0).astype(jnp.float32))  # (B, H, S)

        out = forgetting_attention(qh, kh, vh, log_fgate, block=self.attn_block)
        out2 = out.transpose(2, 0, 1, 3).reshape(S * B, E)               # (S*B, E) bf16

        y = linear_bias(out2, self.wo_t, self.bo_row).reshape(S, B, E)
        return y, jnp.zeros_like(y)


# ----------------------------------------------------------------------------
# Pure-JAX reference for correctness checking
# ----------------------------------------------------------------------------
def reference_forward(mod, x):
    S, B, E = x.shape
    H, D = mod.num_heads, mod.head_dim
    x2 = x.reshape(S * B, E)

    def lin(a, w, b):
        return a @ w.T + b

    q = lin(x2, mod.wq, mod.bq).reshape(S, B, H, D).transpose(1, 2, 0, 3)
    k = lin(x2, mod.wk, mod.bk).reshape(S, B, H, D).transpose(1, 2, 0, 3)
    v = lin(x2, mod.wv, mod.bv).reshape(S, B, H, D).transpose(1, 2, 0, 3)
    fg = lin(x2, mod.wf, mod.bf).reshape(S, B, H).transpose(1, 2, 0)      # (B,H,S)

    log_f = jax.nn.log_sigmoid(fg.astype(jnp.float32))
    c = jnp.cumsum(log_f, axis=-1)                                        # (B,H,S)

    logits = jnp.einsum("bhid,bhjd->bhij", q, k) / math.sqrt(D)
    logits = logits + (c[..., :, None] - c[..., None, :])
    mask = jnp.tril(jnp.ones((S, S), dtype=bool))
    logits = jnp.where(mask, logits, -jnp.inf)
    attn = jax.nn.softmax(logits, axis=-1)
    o = jnp.einsum("bhij,bhjd->bhid", attn, v)                            # (B,H,S,D)
    o = o.transpose(2, 0, 1, 3).reshape(S * B, E)
    y = lin(o, mod.wo, mod.bo).reshape(S, B, E)
    return y


# ----------------------------------------------------------------------------
def _run_case(seq_len, batch, hidden, heads, attn_block, key, tol):
    k_param, k_x = jax.random.split(key)
    module = FoXAttentionPallas(hidden, heads, k_param, attn_block=attn_block)
    x = jax.random.normal(k_x, (seq_len, batch, hidden), jnp.float32)

    out, present = module(x)
    out = jax.block_until_ready(out)
    present = jax.block_until_ready(present)

    ref = reference_forward(module, x)
    assert out.shape == (seq_len, batch, hidden)
    assert present.shape == out.shape
    assert bool(jnp.all(present == 0))
    max_err = float(jnp.max(jnp.abs(out - ref)))
    assert bool(jnp.allclose(out, ref, atol=tol, rtol=tol)), (
        f"mismatch vs reference: max abs err {max_err:.4e}")


if __name__ == "__main__":
    key = jax.random.PRNGKey(0)
    k1, k2 = jax.random.split(key)

    # Main toy config (single attention tile), matches the module's small shapes.
    _run_case(seq_len=8, batch=2, hidden=32, heads=4, attn_block=None, key=k1, tol=2e-2)

    # Multi-block config: exercises online softmax across kv tiles, causal block
    # pruning and the clamped kv index_map (S=256 split into 128-wide tiles).
    _run_case(seq_len=256, batch=1, hidden=16, heads=2, attn_block=128, key=k2, tol=3e-2)

    print("KERNEL_OK")
</pallas_src>

<mosaic_0001>
module attributes {stable_mosaic.version = 11 : i64} {
  func.func @_matmul_bias_kernel(%arg0: i32, %arg1: i32, %arg2: i32, %arg3: memref<16x32xbf16, #tpu.memory_space<vmem>>, %arg4: memref<32x100xbf16, #tpu.memory_space<vmem>>, %arg5: memref<1x100xf32, #tpu.memory_space<vmem>>, %arg6: memref<16x100xf32, #tpu.memory_space<vmem>>, %arg7: memref<16x100xf32, #tpu.memory_space<vmem>>) attributes {dimension_semantics = [#tpu.dimension_semantics<parallel>, #tpu.dimension_semantics<parallel>, #tpu.dimension_semantics<arbitrary>], iteration_bounds = array<i64: 1, 1, 1>, scalar_prefetch = 0 : i64, scratch_operands = 1 : i64, tpu.core_type = #tpu.core_type<tc>, window_params = [{transform_indices = @transform_0, window_bounds = array<i64: 16, 32>}, {transform_indices = @transform_1, window_bounds = array<i64: 32, 100>}, {transform_indices = @transform_2, window_bounds = array<i64: 1, 100>}, {transform_indices = @transform_3, window_bounds = array<i64: 16, 100>}]} {
    %c0_i32 = arith.constant 0 : i32
    %0 = arith.cmpi eq, %arg2, %c0_i32 : i32
    %1 = arith.extui %0 : i1 to i32
    %c0_i32_0 = arith.constant 0 : i32
    %2 = arith.cmpi ne, %1, %c0_i32_0 : i32
    scf.if %2 {
      %cst_10 = arith.constant 0.000000e+00 : f32
      %12 = vector.broadcast %cst_10 : f32 to vector<16x100xf32>
      %c0_11 = arith.constant 0 : index
      %c0_12 = arith.constant 0 : index
      %13 = vector.load %arg7[%c0_11, %c0_12] : memref<16x100xf32, #tpu.memory_space<vmem>>, vector<16x100xf32>
      tpu.vector_store %arg7[%c0_11, %c0_12], %12 {strides = array<i32>} : memref<16x100xf32, #tpu.memory_space<vmem>>, vector<16x100xf32>,
    } else {
    }
    %c0 = arith.constant 0 : index
    %c0_1 = arith.constant 0 : index
    %3 = vector.load %arg7[%c0, %c0_1] : memref<16x100xf32, #tpu.memory_space<vmem>>, vector<16x100xf32>
    %c0_2 = arith.constant 0 : index
    %c0_3 = arith.constant 0 : index
    %4 = vector.load %arg3[%c0_2, %c0_3] : memref<16x32xbf16, #tpu.memory_space<vmem>>, vector<16x32xbf16>
    %c0_4 = arith.constant 0 : index
    %c0_5 = arith.constant 0 : index
    %5 = vector.load %arg4[%c0_4, %c0_5] : memref<32x100xbf16, #tpu.memory_space<vmem>>, vector<32x100xbf16>
    %cst = arith.constant dense<0.000000e+00> : vector<16x100xf32>
    %6 = tpu.matmul %4, %5, %cst {dimension_numbers = #tpu.dot_dimension_numbers<[1], [0], [0], [1], [0, 0, 1, 1], [], []>} : vector<16x32xbf16>, vector<32x100xbf16>, vector<16x100xf32> -> vector<16x100xf32>
    %7 = arith.addf %3, %6 : vector<16x100xf32>
    %c0_6 = arith.constant 0 : index
    %c0_7 = arith.constant 0 : index
    %8 = vector.load %arg7[%c0_6, %c0_7] : memref<16x100xf32, #tpu.memory_space<vmem>>, vector<16x100xf32>
    tpu.vector_store %arg7[%c0_6, %c0_7], %7 {strides = array<i32>} : memref<16x100xf32, #tpu.memory_space<vmem>>, vector<16x100xf32>,
    %c0_i32_8 = arith.constant 0 : i32
    %9 = arith.cmpi eq, %arg2, %c0_i32_8 : i32
    %10 = arith.extui %9 : i1 to i32
    %c0_i32_9 = arith.constant 0 : i32
    %11 = arith.cmpi ne, %10, %c0_i32_9 : i32
    scf.if %11 {
      %c0_10 = arith.constant 0 : index
      %c0_11 = arith.constant 0 : index
      %12 = vector.load %arg7[%c0_10, %c0_11] : memref<16x100xf32, #tpu.memory_space<vmem>>, vector<16x100xf32>
      %c0_12 = arith.constant 0 : index
      %c0_13 = arith.constant 0 : index
      %13 = vector.load %arg5[%c0_12, %c0_13] : memref<1x100xf32, #tpu.memory_space<vmem>>, vector<1x100xf32>
      %14 = vector.broadcast %13 : vector<1x100xf32> to vector<16x100xf32>
      %15 = arith.addf %12, %14 : vector<16x100xf32>
      %c0_14 = arith.constant 0 : index
      %c0_15 = arith.constant 0 : index
      %16 = vector.load %arg6[%c0_14, %c0_15] : memref<16x100xf32, #tpu.memory_space<vmem>>, vector<16x100xf32>
      tpu.vector_store %arg6[%c0_14, %c0_15], %15 {strides = array<i32>} : memref<16x100xf32, #tpu.memory_space<vmem>>, vector<16x100xf32>,
    } else {
    }
    return
  }
  func.func @transform_0(%arg0: i32, %arg1: i32, %arg2: i32) -> (i32, i32) {
    %c0_i32 = arith.constant 0 : i32
    return %arg0, %arg2 : i32, i32
  }
  func.func @transform_1(%arg0: i32, %arg1: i32, %arg2: i32) -> (i32, i32) {
    %c0_i32 = arith.constant 0 : i32
    return %arg2, %arg1 : i32, i32
  }
  func.func @transform_2(%arg0: i32, %arg1: i32, %arg2: i32) -> (i32, i32) {
    %c0_i32 = arith.constant 0 : i32
    %c0_i32_0 = arith.constant 0 : i32
    return %c0_i32, %arg1 : i32, i32
  }
  func.func @transform_3(%arg0: i32, %arg1: i32, %arg2: i32) -> (i32, i32) {
    %c0_i32 = arith.constant 0 : i32
    return %arg0, %arg1 : i32, i32
  }
}

</mosaic_0001>

<bundles_post_ra>
// kernel: tpu_custom_call.1
= control target key start
LH: loop header
LB: loop body
LE: loop exit
PB: predicated region body
PF: predicated region fallthrough
CT: control target
= control target key end

     0   :  { %8 = vsyncpa [#allocation4], 0  ;;  %s301_s0 = inlined_call_operand.hbm [shape: bf16[16,32], index: 0, kind: input, shape index: {}]   ;;  %s302_s1 = inlined_call_operand.hbm [shape: bf16[32,100], index: 1, kind: input, shape index: {}]   ;;  %s303_s2 = inlined_call_operand.vmem [shape: f32[1,100], index: 2, kind: input, shape index: {}]   ;;  %s304_s3 = inlined_call_operand.hbm [shape: f32[16,100], index: 3, kind: output, shape index: {}]  }
   0x1   :  { %9 = vsyncpa [#allocation7], 0 }
   0x2   :  { %10 = vsyncpa [#allocation5], 0  ;;  %s254_s12 = smov [#allocation3]  }
   0x3   :  { %s16_s13 = sshll.u32 %s254_s12, 4  ;;  %s17_s13 = int_to_ptr.vmem [resolvable:$true] %s16_s13 }
   0x4   :  { %s196_s14 = scalar_lea.vmem %s17_s13, 128  ;;  %p201_p1 = scmp.lt.s32.totalorder %s17_s13, %s17_s13 }
   0x5   :  { %p197_p0 = scmp.ne.s32.totalorder %s17_s13, %s196_s14  ;;  %p202_p2 = scmp.lt.s32.totalorder %s196_s14, %s196_s14 }
   0x7   :  { %p203_p3 = por %p202_p2, %p201_p1 }
   0x9   :  { %p204_p4 = pnand %p203_p3, %p197_p0 }
   0xb   :  { %207 = shalt.err (!%p204_p4)
}
   0xc   :  { %s255_s15 = smov 64   ;;  %s256_s16 = smov 4  }
   0xd   :  { %22 = dma.hbm_to_vmem [thread:$0]  %s301_s0, 128, %s17_s13, [#allocation4], %s255_s15, %s255_s15, %s256_s16  }
   0xe   :  { %s257_s19 = smov [#allocation6]  }
   0xf   :  { %s28_s20 = sshll.u32 %s257_s19, 4  ;;  %s29_s20 = int_to_ptr.vmem [resolvable:$true] %s28_s20 }
  0x10   :  { %s216_s21 = scalar_lea.vmem %s29_s20, 256  ;;  %p221_p6 = scmp.lt.s32.totalorder %s29_s20, %s29_s20 }
  0x11   :  { %p217_p5 = scmp.ne.s32.totalorder %s29_s20, %s216_s21  ;;  %p222_p7 = scmp.lt.s32.totalorder %s216_s21, %s216_s21 }
  0x13   :  { %p223_p8 = por %p222_p7, %p221_p6 }
  0x15   :  { %p224_p9 = pnand %p223_p8, %p217_p5 }
  0x17   :  { %227 = shalt.err (!%p224_p9)
}
  0x18   :  { %34 = dma.hbm_to_vmem [thread:$0]  %s302_s1, 256, %s29_s20, [#allocation7], %s255_s15, %s255_s15, %s256_s16  }
  0x19   :  { %248 = dma.done.wait [#allocation4], 128  }
  0x1a   :  { %249 = vsyncadd [#allocation4], 4294967168 }
  0x1b   :  { %250 = dma.done.wait [#allocation7], 256  }
  0x1c   :  { %251 = vsyncadd [#allocation7], 4294967040  ;;  %vm48_vm0 = vcmask 818176   ;;  %v258_v0 = vmov 0.0   ;;  %vm259_vm1 = vmmov 0   ;;  %v185_v1 = vld [vmem:[#allocation6 + $0x8] sm:$0xff]  }
  0x1d   :  { %49 = vst.msk [vmem:[#allocation2] sm:$0xff] %vm48_vm0, %v258_v0  ;;  %50 = vst.msk [vmem:[#allocation2 + $0x8] sm:$0xff] %vm48_vm0, %v258_v0  ;;  %168 = vmatprep.subr.bf16.mxu0 %v258_v0  ;;  %172 = vmatprep.mubr.msk.bf16.mxu0 %vm259_vm1, %v258_v0  ;;  %v186_v2 = vld [vmem:[#allocation6] sm:$0xff]   ;;  %v187_v3 = vld [vmem:[#allocation3] sm:$0xff]   ;;  %vm76_vm2 = vcmask 261120   ;;  %s260_s24 = smov [#allocation8]  }
  0x1e   :  { %169 = vmatpush3.bf16.msra.mxu0 %v185_v1  ;;  %v164_v12 = vld [vmem:[%s303_s2] ss:$0 sm:$0xff]  ;;  %s147_s25 = sshll.u32 %s260_s24, 4  ;;  %s148_s25 = int_to_ptr.vmem [resolvable:$true] %s147_s25 }
  0x1f   :  { %170 = vmatprep.subr.bf16.mxu0 %v258_v0  ;;  %s228_s26 = scalar_lea.vmem %s148_s25, 256  ;;  %p233_p11 = scmp.lt.s32.totalorder %s148_s25, %s148_s25 }
  0x20   :  { %p229_p10 = scmp.ne.s32.totalorder %s148_s25, %s228_s26  ;;  %p234_p12 = scmp.lt.s32.totalorder %s228_s26, %s228_s26 }
  0x22   :  { %171 = vmatpush3.bf16.msra.mxu0 %v186_v2  ;;  %p235_p13 = por %p234_p12, %p233_p11 }
  0x24   :  { %v51_v4 = vld [vmem:[#allocation2] sm:$0xff]  ;;  %v52_v8 = vld [vmem:[#allocation2 + $0x8] sm:$0xff]  ;;  %p236_p0 = pnand %p235_p13, %p229_p10 }
  0x25   :  { %173 = vmatmul.mubr.msk.bf16.vlgmr.msra.gmra.mxu0 %vm76_vm2, %v187_v3 }
  0xe5   :  { %v114_v5 = vpop.f32.mrf.mxu0 }
  0xe6   :  { %v121_v6 = vadd.f32 %v114_v5, %v51_v4 }
  0xe7   :  { %v174_v7 = vpop.f32.mrf.mxu0 }
  0xe8   :  { %124 = vst.msk [vmem:[#allocation2] sm:$0xff] %vm48_vm0, %v121_v6 }
  0xe9   :  { %v117_v9 = vpop.f32.mrf.mxu0 }
  0xea   :  { %v122_v10 = vadd.f32 %v117_v9, %v52_v8 }
  0xeb   :  { %v175_v11 = vpop.f32.mrf.mxu0 }
  0xec   :  { %125 = vst.msk [vmem:[#allocation2 + $0x8] sm:$0xff] %vm48_vm0, %v122_v10 }
  0xef   :  { %v129_v13 = vld [vmem:[#allocation2] sm:$0xff] }
  0xf0   :  { %v138_v14 = vadd.f32 %v164_v12, %v129_v13 }
  0xf2   :  { %140 = vst.msk [vmem:[#allocation8] sm:$0xff] %vm48_vm0, %v138_v14 }
  0xf3   :  { %v130_v15 = vld [vmem:[#allocation2 + $0x8] sm:$0xff] }
  0xf4   :  { %v139_v16 = vadd.f32 %v164_v12, %v130_v15 }
  0xf6   :  { %141 = vst.msk [vmem:[#allocation8 + $0x8] sm:$0xff] %vm48_vm0, %v139_v16 }
  0xf7   :  { %239 = shalt.err (!%p236_p0)
}
  0xf8   :  { %s261_s27 = smov 128   ;;  %s262_s2 = smov 8  }
  0xf9   :  { %153 = dma.vmem_to_hbm [thread:$0]  %s148_s25, 256, %s304_s3, [#allocation5], %s261_s27, %s261_s27, %s262_s2  }
  0xfa   :  { %252 = dma.done.wait [#allocation5], 256  }
  0xfb   :  { %253 = vsyncadd [#allocation5], 4294967040 }
  0xfc   :  { %157 = vsyncpa [#allocation4], 1 }
  0xfd   :  { %158 = vsyncpa [#allocation7], 1 }
  0xfe   :  { %159 = vsyncpa [#allocation5], 1 }

</bundles_post_ra>
